<compile_context>
chip_gen: v7x
topology: tpu7x:2x2x1
jax: 0.10.0
libtpu: 0.0.40
codegen_flags: <defaults>
</compile_context>

<pallas_src>
import functools

import jax
import jax.numpy as jnp
from jax.experimental import pallas as pl
from jax.experimental.pallas import tpu as pltpu


def _round_up(a, b):
    return ((a + b - 1) // b) * b


def _pad_to(arr, shape):
    return jnp.pad(arr, [(0, s - d) for d, s in zip(arr.shape, shape)])


# ----------------------------------------------------------------------------- kernel
def _fused_mlp_kernel(*refs, num_layers):
    # refs = (x_ref, w1_ref, b1_ref, ..., wL_ref, bL_ref, o_ref)
    x_ref = refs[0]
    o_ref = refs[-1]
    h = x_ref[...]                                   # (tile_m, K_pad) compute dtype
    for li in range(num_layers):
        w_ref = refs[1 + 2 * li]                     # (din_pad, dout_pad) compute dtype
        b_ref = refs[2 + 2 * li]                     # (1, dout_pad) f32 (BN+bias folded)
        y = jnp.dot(h, w_ref[...], preferred_element_type=jnp.float32) + b_ref[...]
        if li < num_layers - 1:
            # ReLU; dropout(p=0.5) is identity in eval mode
            y = jnp.maximum(y, 0.0).astype(w_ref.dtype)
        h = y
    o_ref[...] = h.astype(o_ref.dtype)


# ----------------------------------------------------------------------------- wrapper
def _auto_tile_m(m):
    if m <= 16:
        return _round_up(m, 8)
    # >= 2 grid steps when the batch allows (v7x megacore), tiles capped at 512 rows.
    return min(512, _round_up(pl.cdiv(m, 2), 8))


def mlp_forward(x, prepared, *, tile_m=None):
    """Fused eval-mode MLP forward. `prepared` comes from prepare_mlp_params."""
    m, k = x.shape
    num_layers = len(prepared)
    compute_dtype = prepared[0]["w"].dtype
    k_pad = prepared[0]["w"].shape[0]
    n = prepared[-1]["fan_out"]
    n_pad = prepared[-1]["w"].shape[1]
    assert k <= k_pad

    if tile_m is None:
        tile_m = _auto_tile_m(m)
    m_pad = _round_up(m, tile_m)
    grid = (m_pad // tile_m,)

    x_p = _pad_to(x, (m_pad, k_pad)).astype(compute_dtype)

    operands = [x_p]
    in_specs = [pl.BlockSpec((tile_m, k_pad), lambda i: (i, 0))]
    for p in prepared:
        din, dout = p["w"].shape
        operands += [p["w"], p["b"]]
        in_specs += [
            pl.BlockSpec((din, dout), lambda i: (0, 0)),   # resident folded weight
            pl.BlockSpec((1, dout), lambda i: (0, 0)),     # resident folded bias (f32)
        ]
    out_spec = pl.BlockSpec((tile_m, n_pad), lambda i: (i, 0))

    # Advisory cost estimate for the XLA scheduler.
    itemsize = jnp.dtype(compute_dtype).itemsize
    flops = 0
    weight_bytes = 0
    for p in prepared:
        din, dout = p["w"].shape
        flops += 2 * m_pad * din * dout
        weight_bytes += p["w"].size * p["w"].dtype.itemsize
        weight_bytes += p["b"].size * p["b"].dtype.itemsize
    io_bytes = x_p.size * itemsize + m_pad * n_pad * 4
    cost = pl.CostEstimate(flops=int(flops), transcendentals=0,
                           bytes_accessed=int(io_bytes + weight_bytes))

    # VMEM budget: double-buffered x/out tiles + resident weights + f32 intermediates.
    tile_io_bytes = 2 * (tile_m * k_pad * itemsize + tile_m * n_pad * 4)
    interm_bytes = sum(tile_m * p["w"].shape[1] * 4 for p in prepared)
    vmem_limit = int(min(max(2 * weight_bytes + tile_io_bytes + interm_bytes + (16 << 20),
                             32 << 20), 64 << 20))

    kernel = functools.partial(_fused_mlp_kernel, num_layers=num_layers)
    out_pad = pl.pallas_call(
        kernel,
        out_shape=jax.ShapeDtypeStruct((m_pad, n_pad), jnp.float32),
        grid_spec=pltpu.PrefetchScalarGridSpec(
            num_scalar_prefetch=0,
            grid=grid,
            in_specs=in_specs,
            out_specs=out_spec,
        ),
        compiler_params=pltpu.CompilerParams(
            dimension_semantics=("parallel",),
            vmem_limit_bytes=vmem_limit,
        ),
        cost_estimate=cost,
    )(*operands)
    return out_pad[:m, :n]


# ----------------------------------------------------------------------------- params
def init_mlp_params(key, in_channels, hidden_channels, out_channels, num_layers):
    """Deterministic synthetic parameters matching the torch module's shapes (raw form)."""
    out_channels = out_channels if out_channels is not None else hidden_channels
    dims = [in_channels] + [hidden_channels] * (num_layers - 1) + [out_channels]
    params = []
    for li in range(num_layers):
        fan_in, fan_out = dims[li], dims[li + 1]
        key, kw, kb, kg, kbt, km, kv = jax.random.split(key, 7)
        bound = 1.0 / jnp.sqrt(jnp.float32(fan_in))
        params.append(dict(
            w=jax.random.uniform(kw, (fan_out, fan_in), jnp.float32, -bound, bound),
            b=jax.random.uniform(kb, (fan_out,), jnp.float32, -bound, bound),
            gamma=1.0 + 0.1 * jax.random.normal(kg, (fan_out,), jnp.float32),
            beta=0.1 * jax.random.normal(kbt, (fan_out,), jnp.float32),
            mean=0.1 * jax.random.normal(km, (fan_out,), jnp.float32),
            var=1.0 + 0.1 * jax.random.uniform(kv, (fan_out,), jnp.float32),
        ))
    return params


def prepare_mlp_params(raw_params, *, eps=1e-5, compute_dtype=jnp.bfloat16):
    """Fold BN(eval)+bias into the weights (in f32), pad lane dims to 128, cast."""
    prepared = []
    for p in raw_params:
        scale = p["gamma"] * jax.lax.rsqrt(p["var"] + eps)      # f32 fold
        w_f = p["w"].T * scale[None, :]                         # (fan_in, fan_out)
        b_f = (p["b"] - p["mean"]) * scale + p["beta"]
        fan_in, fan_out = w_f.shape
        in_pad, out_pad = _round_up(fan_in, 128), _round_up(fan_out, 128)
        prepared.append(dict(
            w=_pad_to(w_f, (in_pad, out_pad)).astype(compute_dtype),
            b=_pad_to(b_f.reshape(1, fan_out), (1, out_pad)).astype(jnp.float32),
            fan_in=fan_in, fan_out=fan_out,
        ))
    return prepared


# ----------------------------------------------------------------------------- refs
def mlp_reference_f32(x, raw_params, eps=1e-5):
    """Exact eval-mode module semantics in f32."""
    num_layers = len(raw_params)
    h = x
    for i, p in enumerate(raw_params):
        h = h @ p["w"].T + p["b"]
        h = (h - p["mean"]) * jax.lax.rsqrt(p["var"] + eps) * p["gamma"] + p["beta"]
        if i < num_layers - 1:
            h = jnp.maximum(h, 0.0)
    return h


def mlp_reference_folded(x, prepared):
    """Same numerical recipe as the kernel (folded params, bf16 matmul, f32 accum)."""
    num_layers = len(prepared)
    k_pad = prepared[0]["w"].shape[0]
    h = _pad_to(x, (x.shape[0], k_pad)).astype(prepared[0]["w"].dtype)
    for i, p in enumerate(prepared):
        y = jnp.dot(h, p["w"], preferred_element_type=jnp.float32) + p["b"]
        if i < num_layers - 1:
            y = jnp.maximum(y, 0.0).astype(p["w"].dtype)
        h = y
    return h[:, :prepared[-1]["fan_out"]].astype(jnp.float32)


# ----------------------------------------------------------------------------- main
if __name__ == "__main__":
    # Small shapes consistent with the module: x is [batch, in_channels].
    batch, in_channels, hidden_channels = 64, 16, 32
    num_layers = 2

    key = jax.random.PRNGKey(0)
    kx, kp = jax.random.split(key)
    x = jax.random.normal(kx, (batch, in_channels), jnp.float32)

    raw_params = init_mlp_params(kp, in_channels, hidden_channels, None, num_layers)
    prepared = prepare_mlp_params(raw_params, compute_dtype=jnp.bfloat16)

    out = mlp_forward(x, prepared)
    out = jax.block_until_ready(out)
    assert out.shape == (batch, hidden_channels)

    # Tight check: kernel matches the identical folded/bf16/f32-accum recipe.
    ref_folded = mlp_reference_folded(x, prepared)
    assert jnp.allclose(out, ref_folded, atol=1e-4, rtol=1e-4), "mismatch vs folded reference"

    # Semantic check: close to the full-f32 module reference (bf16 matmul tolerance).
    ref_f32 = mlp_reference_f32(x, raw_params)
    rel_err = jnp.max(jnp.abs(out - ref_f32)) / (jnp.max(jnp.abs(ref_f32)) + 1e-6)
    assert rel_err < 5e-2, f"semantic mismatch vs f32 reference (rel_err={rel_err})"

    print("KERNEL_OK")
</pallas_src>

<mosaic_0001>
module attributes {stable_mosaic.version = 11 : i64} {
  func.func @_fused_mlp_kernel(%arg0: i32, %arg1: memref<32x128xbf16, #tpu.memory_space<vmem>>, %arg2: memref<128x128xbf16, #tpu.memory_space<vmem>>, %arg3: memref<1x128xf32, #tpu.memory_space<vmem>>, %arg4: memref<128x128xbf16, #tpu.memory_space<vmem>>, %arg5: memref<1x128xf32, #tpu.memory_space<vmem>>, %arg6: memref<32x128xf32, #tpu.memory_space<vmem>>) attributes {dimension_semantics = [#tpu.dimension_semantics<parallel>], iteration_bounds = array<i64: 2>, scalar_prefetch = 0 : i64, scratch_operands = 0 : i64, tpu.core_type = #tpu.core_type<tc>, window_params = [{transform_indices = @transform_0, window_bounds = array<i64: 32, 128>}, {pipeline_mode = #tpu.pipeline_mode<synchronous>, transform_indices = @transform_1, window_bounds = array<i64: 128, 128>}, {pipeline_mode = #tpu.pipeline_mode<synchronous>, transform_indices = @transform_2, window_bounds = array<i64: 1, 128>}, {pipeline_mode = #tpu.pipeline_mode<synchronous>, transform_indices = @transform_3, window_bounds = array<i64: 128, 128>}, {pipeline_mode = #tpu.pipeline_mode<synchronous>, transform_indices = @transform_4, window_bounds = array<i64: 1, 128>}, {transform_indices = @transform_5, window_bounds = array<i64: 32, 128>}]} {
    %c0 = arith.constant 0 : index
    %c0_0 = arith.constant 0 : index
    %0 = vector.load %arg1[%c0, %c0_0] : memref<32x128xbf16, #tpu.memory_space<vmem>>, vector<32x128xbf16>
    %c0_1 = arith.constant 0 : index
    %c0_2 = arith.constant 0 : index
    %1 = vector.load %arg2[%c0_1, %c0_2] : memref<128x128xbf16, #tpu.memory_space<vmem>>, vector<128x128xbf16>
    %cst = arith.constant dense<0.000000e+00> : vector<32x128xf32>
    %2 = tpu.matmul %0, %1, %cst {dimension_numbers = #tpu.dot_dimension_numbers<[1], [0], [0], [1], [0, 0, 1, 1], [], []>} : vector<32x128xbf16>, vector<128x128xbf16>, vector<32x128xf32> -> vector<32x128xf32>
    %c0_3 = arith.constant 0 : index
    %c0_4 = arith.constant 0 : index
    %3 = vector.load %arg3[%c0_3, %c0_4] : memref<1x128xf32, #tpu.memory_space<vmem>>, vector<1x128xf32>
    %4 = vector.broadcast %3 : vector<1x128xf32> to vector<32x128xf32>
    %5 = arith.addf %2, %4 : vector<32x128xf32>
    %cst_5 = arith.constant 0.000000e+00 : f32
    %6 = vector.broadcast %cst_5 : f32 to vector<32x128xf32>
    %7 = arith.maximumf %5, %6 : vector<32x128xf32>
    %8 = arith.truncf %7 : vector<32x128xf32> to vector<32x128xbf16>
    %c0_6 = arith.constant 0 : index
    %c0_7 = arith.constant 0 : index
    %9 = vector.load %arg4[%c0_6, %c0_7] : memref<128x128xbf16, #tpu.memory_space<vmem>>, vector<128x128xbf16>
    %cst_8 = arith.constant dense<0.000000e+00> : vector<32x128xf32>
    %10 = tpu.matmul %8, %9, %cst_8 {dimension_numbers = #tpu.dot_dimension_numbers<[1], [0], [0], [1], [0, 0, 1, 1], [], []>} : vector<32x128xbf16>, vector<128x128xbf16>, vector<32x128xf32> -> vector<32x128xf32>
    %c0_9 = arith.constant 0 : index
    %c0_10 = arith.constant 0 : index
    %11 = vector.load %arg5[%c0_9, %c0_10] : memref<1x128xf32, #tpu.memory_space<vmem>>, vector<1x128xf32>
    %12 = vector.broadcast %11 : vector<1x128xf32> to vector<32x128xf32>
    %13 = arith.addf %10, %12 : vector<32x128xf32>
    %c0_11 = arith.constant 0 : index
    %c0_12 = arith.constant 0 : index
    %14 = vector.load %arg6[%c0_11, %c0_12] : memref<32x128xf32, #tpu.memory_space<vmem>>, vector<32x128xf32>
    tpu.vector_store %arg6[%c0_11, %c0_12], %13 {strides = array<i32>} : memref<32x128xf32, #tpu.memory_space<vmem>>, vector<32x128xf32>,
    return
  }
  func.func @transform_0(%arg0: i32) -> (i32, i32) {
    %c0_i32 = arith.constant 0 : i32
    %c0_i32_0 = arith.constant 0 : i32
    return %arg0, %c0_i32 : i32, i32
  }
  func.func @transform_1(%arg0: i32) -> (i32, i32) {
    %c0_i32 = arith.constant 0 : i32
    %c0_i32_0 = arith.constant 0 : i32
    %c0_i32_1 = arith.constant 0 : i32
    return %c0_i32, %c0_i32_0 : i32, i32
  }
  func.func @transform_2(%arg0: i32) -> (i32, i32) {
    %c0_i32 = arith.constant 0 : i32
    %c0_i32_0 = arith.constant 0 : i32
    %c0_i32_1 = arith.constant 0 : i32
    return %c0_i32, %c0_i32_0 : i32, i32
  }
  func.func @transform_3(%arg0: i32) -> (i32, i32) {
    %c0_i32 = arith.constant 0 : i32
    %c0_i32_0 = arith.constant 0 : i32
    %c0_i32_1 = arith.constant 0 : i32
    return %c0_i32, %c0_i32_0 : i32, i32
  }
  func.func @transform_4(%arg0: i32) -> (i32, i32) {
    %c0_i32 = arith.constant 0 : i32
    %c0_i32_0 = arith.constant 0 : i32
    %c0_i32_1 = arith.constant 0 : i32
    return %c0_i32, %c0_i32_0 : i32, i32
  }
  func.func @transform_5(%arg0: i32) -> (i32, i32) {
    %c0_i32 = arith.constant 0 : i32
    %c0_i32_0 = arith.constant 0 : i32
    return %arg0, %c0_i32 : i32, i32
  }
}

</mosaic_0001>

<bundles_post_ra>
// kernel: tpu_custom_call.1
= control target key start
LH: loop header
LB: loop body
LE: loop exit
PB: predicated region body
PF: predicated region fallthrough
CT: control target
= control target key end

     0   :  { %10 = vsyncpa [#allocation3], 0  ;;  %s1286_s0 = inlined_call_operand.hbm [shape: bf16[64,128], index: 0, kind: input, shape index: {}]   ;;  %s1287_s1 = inlined_call_operand.hbm [shape: bf16[128,128], index: 1, kind: input, shape index: {}]   ;;  %s1288_s2 = inlined_call_operand.vmem [shape: f32[1,128], index: 2, kind: input, shape index: {}]   ;;  %s1289_s3 = inlined_call_operand.hbm [shape: bf16[128,128], index: 3, kind: input, shape index: {}]   ;;  %s1290_s4 = inlined_call_operand.vmem [shape: f32[1,128], index: 4, kind: input, shape index: {}]   ;;  %s1291_s5 = inlined_call_operand.hbm [shape: f32[64,128], index: 5, kind: output, shape index: {}]  }
   0x1   :  { %12 = vsyncpa [#allocation3 + $0x1], 0 }
   0x2   :  { %13 = vsyncpa [#allocation6], 0 }
   0x3   :  { %14 = vsyncpa [#allocation4], 0 }
   0x4   :  { %16 = vsyncpa [#allocation4 + $0x1], 0  ;;  %s1032_s18 = smov 0   ;;  %s1034_s19 = smov 0  }
   0x5   :  { %s1036_s20 = smov 0   ;;  %s1038_s21 = smov 0  }
   0x6 LB: > { %s1053_s22 = sadd.s32 4294967295, %s992_s21   ;;  %s647_s23 = sadd.s32 4294967294, %s992_s21   ;;  %s992_s21 = sphi %s1038_s21, %s1311_s21   ;;  %s988_s20 = sphi %s1036_s20, %s1310_s20   ;;  %s984_s19 = sphi %s1034_s19, %s1309_s19   ;;  %s980_s18 = sphi %s1032_s18, %s1308_s18  }
   0x7   : > { %p42_p0 = scmp.ne.s32.totalorder %s984_s19, %s980_s18  ;;  %p1292_p1 = scmp.eq.s32.totalorder %s1053_s22, 0 }
   0x8   : > { %p156_p3 = scmp.eq.s32.totalorder %s647_s23, 1  ;;  %p648_p5 = scmp.ge.s32.totalorder %s992_s21, 1 }
   0x9   : > { %p1062_p4 = por %p1292_p1, %p42_p0  ;;  %p163_p7 = scmp.lt.s32.totalorder %s992_s21, 3 }
   0xa   : > { %p1067_p6 = por %p156_p3, %p42_p0  ;;  %s994_s27 = smov [#allocation5]  }
   0xb   : > { %s1295_s24 = scalar_select %p1062_p4, 1, 0 }
   0xc   : > { %s1296_s25 = scalar_select %p1067_p6, 1, 0 }
   0xd   : > { %p1072_p8 = pnand %p648_p5, %p163_p7  ;;  %s175_s28 = sshll.u32 %s994_s27, 4  ;;  %s1076_s28 = int_to_ptr.vmem [resolvable:$true] %s175_s28 }
   0xe   : > { %s995_s30 = smov [#allocation7]   ;;  %s836_s9 = scalar_lea.hbm %s1287_s1, 1024 }
   0xf   : > { %p759_p9 = pneg %p1072_p8  ;;  %s191_s6 = sshll.u32 %s995_s30, 4  ;;  %s1087_s6 = int_to_ptr.vmem [resolvable:$true] %s191_s6 }
  0x10   : > { %p837_p12 = scmp.ne.s32.totalorder %s1287_s1, %s836_s9  ;;  %p843_p5 = scmp.lt.u32.totalorder %s836_s9, %s1287_s1 }
  0x11   : > { %p1083_p11 = pnand %p759_p9, %p1292_p1 }
  0x13   : > { %p838_p13 = pneg %p1083_p11 }
  0x15   : > { %p839_p0 = pnand %p838_p13, %p837_p12 }
  0x17   : > { %p840_p3 = pneg %p839_p0 }
  0x19   : > { %p845_p7 = pnand %p843_p5, %p840_p3 }
  0x1b   : > { %848 = shalt.err (!%p845_p7)
}
  0x1c   : > { %s849_s14 = scalar_lea.vmem %s1076_s28, 1024  ;;  %p857_p2 = scmp.lt.s32.totalorder %s1076_s28, %s1076_s28 }
  0x1d   : > { %p850_p9 = scmp.ne.s32.totalorder %s1076_s28, %s849_s14  ;;  %p858_p12 = scmp.lt.s32.totalorder %s849_s14, %s849_s14 }
  0x1f   : > { %p852_p10 = pnand %p850_p9, %p838_p13  ;;  %p859_p0 = por %p858_p12, %p857_p2 }
  0x21   : > { %p853_p1 = pneg %p852_p10 }
  0x23   : > { %p860_p6 = pnand %p859_p0, %p853_p1 }
  0x25   : > { %863 = shalt.err (!%p860_p6)
}
  0x26   : > { %s996_s15 = smov 64   ;;  %s997_s16 = smov 4  }
  0x27   : > { %762 = dma.hbm_to_vmem [thread:$0]  (!%p1083_p11), %s1287_s1, 1024, %s1076_s28, [#allocation6], %s996_s15, %s996_s15, %s997_s16  }
  0x28   : > { %s864_s7 = scalar_lea.hbm %s1289_s3, 1024 }
  0x29   : > { %p865_p1 = scmp.ne.s32.totalorder %s1289_s3, %s864_s7  ;;  %p871_p10 = scmp.lt.u32.totalorder %s864_s7, %s1289_s3 }
  0x2b   : > { %p867_p2 = pnand %p865_p1, %p838_p13 }
  0x2d   : > { %p868_p6 = pneg %p867_p2 }
  0x2f   : > { %p873_p3 = pnand %p871_p10, %p868_p6 }
  0x31   : > { %876 = shalt.err (!%p873_p3)
}
  0x32   : > { %s877_s28 = scalar_lea.vmem %s1087_s6, 1024  ;;  %p885_p12 = scmp.lt.s32.totalorder %s1087_s6, %s1087_s6 }
  0x33   : > { %p878_p5 = scmp.ne.s32.totalorder %s1087_s6, %s877_s28  ;;  %p886_p0 = scmp.lt.s32.totalorder %s877_s28, %s877_s28 }
  0x35   : > { %p880_p7 = pnand %p878_p5, %p838_p13  ;;  %p887_p1 = por %p886_p0, %p885_p12 }
  0x37   : > { %p881_p9 = pneg %p880_p7 }
  0x39   : > { %p888_p2 = pnand %p887_p1, %p881_p9 }
  0x3b   : > { %891 = shalt.err (!%p888_p2)
}
  0x3c   : > { %765 = dma.hbm_to_vmem [thread:$0]  (!%p1083_p11), %s1289_s3, 1024, %s1087_s6, [#allocation6], %s996_s15, %s996_s15, %s997_s16  }
  0x3d   : > { %s1148_s29 = sadd.s32 1, %s992_s21   ;;  %s29_s14 = sadd.s32 1, %s988_s20 }
  0x3e   : > { %s26_s17 = ssub.s32 %s992_s21, %s1148_s29  ;;  %p36_p13 = scmp.ne.s32.totalorder %s988_s20, %s984_s19 }
  0x3f   : > { %p27_p6 = scmp.eq.s32.totalorder %s26_s17, 0  ;;  %p37_p10 = scmp.eq.s32.totalorder %s992_s21, 0 }
  0x40   : > { %p1299_p3 = scmp.eq.s32.totalorder %s1053_s22, 1  ;;  %p776_p7 = scmp.lt.s32.totalorder %s992_s21, 2 }
  0x41   : > { %s1164_s27 = scalar_select %p27_p6, %s988_s20, %s29_s14  }
  0x42   : > { %p1158_p5 = por %p1299_p3, %p36_p13  ;;  %p38_p9 = por %p37_p10, %p36_p13 }
  0x43   : > { %s208_s30 = sand.u32 1, %s988_s20   ;;  %s685_s6 = sshll.u32 %s992_s21, 8 }
  0x44   : > { %s1300_s23 = scalar_select %p1158_p5, 1, 0 }
  0x45   : > { %s652_s7 = sshll.u32 %s208_s30, 4  ;;  %s1171_s10 = scalar_lea.hbm %s1286_s0, %s685_s6 }
  0x46   : > { %s212_s11 = scalar_lea.vmem [#allocation2], %s652_s7  ;;  %p1175_p11 = pnand %p776_p7, %p38_p9 }
  0x47   : > { %s219_s28 = sshll.u32 %s212_s11, 4  ;;  %s1179_s13 = scalar_lea.sflag [#allocation3], %s208_s30  ;;  %s1173_s28 = int_to_ptr.vmem [resolvable:$true] %s219_s28 }
  0x48   : > { %s892_s14 = scalar_lea.hbm %s1171_s10, 256  ;;  %p894_p0 = pneg %p1175_p11 }
  0x49   : > { %p893_p12 = scmp.ne.s32.totalorder %s1171_s10, %s892_s14  ;;  %s897_s6 = scalar_lea.hbm %s1286_s0, 512 }
  0x4a   : > { %p898_p13 = scmp.lt.u32.totalorder %s1171_s10, %s1286_s0  ;;  %p899_p6 = scmp.lt.u32.totalorder %s897_s6, %s892_s14 }
  0x4b   : > { %p895_p1 = pnand %p894_p0, %p893_p12  ;;  %p901_p3 = scmp.lt.u32.totalorder %s892_s14, %s1171_s10 }
  0x4c   : > { %p900_p10 = por %p899_p6, %p898_p13 }
  0x4d   : > { %p896_p2 = pneg %p895_p1 }
  0x4e   : > { %p902_p7 = por %p901_p3, %p900_p10 }
  0x50   : > { %p903_p9 = pnand %p902_p7, %p896_p2 }
  0x52   : > { %906 = shalt.err (!%p903_p9)
}
  0x53   : > { %s907_s30 = scalar_lea.vmem %s1173_s28, 256  ;;  %s998_s11 = smov [#allocation2]  }
  0x54   : > { %p908_p12 = scmp.ne.s32.totalorder %s1173_s28, %s907_s30  ;;  %s912_s17 = sshll.u32 %s998_s11, 4  ;;  %s913_s17 = int_to_ptr.vmem [resolvable:$false] %s912_s17 }
  0x55   : > { %s914_s7 = scalar_lea.vmem %s913_s17, 512  ;;  %p915_p4 = scmp.lt.s32.totalorder %s1173_s28, %s913_s17 }
  0x56   : > { %p910_p1 = pnand %p908_p12, %p894_p0  ;;  %p916_p13 = scmp.lt.s32.totalorder %s914_s7, %s907_s30 }
  0x58   : > { %p911_p5 = pneg %p910_p1  ;;  %p917_p6 = por %p916_p13, %p915_p4 }
  0x5a   : > { %p918_p10 = pnand %p917_p6, %p911_p5 }
  0x5c   : > { %921 = shalt.err (!%p918_p10)
}
  0x5d   : > { %769 = dma.hbm_to_vmem [thread:$0]  (!%p1175_p11), %s1171_s10, 256, %s1173_s28, %s1179_s13, %s996_s15, %s996_s15, %s997_s16  }
  0x5e   : > { %231 = sbr.rel (%p1072_p8) target bundleno = 592 (0x250), region = 40  ;;  %s1213_s14 = sand.u32 (!%p1072_p8), 1, %s984_s19  }
  0x5f   : > { %s656_s6 = sshll.u32 (!%p1072_p8), %s1213_s14, 4  ;;  %s234_s8 = scalar_lea.sflag (!%p1072_p8), [#allocation3], %s1213_s14 }
  0x60   : > { %s1217_s9 = scalar_lea.vmem (!%p1072_p8), [#allocation2], %s656_s6  ;;  %p1302_p4 = scmp.ne.s32.totalorder (!%p1072_p8), %s1295_s24, 0 }
  0x65   : > { %967 = dma.done.wait (%p1302_p4), %s234_s8, 256  }
  0x66   : > { %969 = vsyncadd (%p1302_p4), %s234_s8, 4294967040  ;;  %p1303_p5 = scmp.eq.s32.totalorder %s1053_s22, 0 }
  0x68   : > { %971 = dma.done.wait (%p1303_p5), [#allocation6], 2048   ;;  %p1304_p8 = pmov %p1303_p5 }
  0x69   : > { %v818_v0 = vld [vmem:[#allocation5] sm:$0xff]   ;;  %v819_v1 = vld [vmem:[#allocation5 + $0x8] sm:$0xff]   ;;  %v820_v2 = vld [vmem:[#allocation5 + $0x10] sm:$0xff]   ;;  %s659_s15 = sshll.u32 %s1213_s14, 5  ;;  %s686_s13 = sshll.u32 %s1053_s22, 9 }
  0x6a   : > { %973 = vsyncadd (%p1304_p8), [#allocation6], 4294965248  ;;  %707 = vmatprep.subr.bf16.mxu0 %v818_v0  ;;  %v821_v3 = vld [vmem:[#allocation5 + $0x18] sm:$0xff]   ;;  %v826_v4 = vld [vmem:[%s1217_s9] sm:$0xff]   ;;  %s271_s28 = scalar_lea.vmem [#allocation8], %s659_s15  ;;  %s1242_s17 = scalar_lea.hbm %s1291_s5, %s686_s13 }
  0x6b   : > { %708 = vmatpush3.bf16.msra.mxu0 %v818_v0  ;;  %723 = vmatprep.mubr.bf16.mxu0 %v826_v4  ;;  %v828_v5 = vld [vmem:[#allocation7] sm:$0xff]   ;;  %v829_v6 = vld [vmem:[#allocation7 + $0x8] sm:$0xff]   ;;  %v830_v8 = vld [vmem:[#allocation7 + $0x10] sm:$0xff]   ;;  %s555_s12 = sshll.u32 %s271_s28, 4  ;;  %s542_s22 = scalar_lea.sflag [#allocation4], %s1213_s14  ;;  %s1237_s12 = int_to_ptr.vmem [resolvable:$true] %s555_s12 }
  0x6c   : > { %709 = vmatprep.subr.bf16.mxu0 %v819_v1  ;;  %v822_v7 = vld [vmem:[#allocation5 + $0x20] sm:$0xff]   ;;  %727 = vmatprep.subr.bf16.mxu1 %v828_v5  ;;  %v823_v9 = vld [vmem:[#allocation5 + $0x28] sm:$0xff]   ;;  %v831_v10 = vld [vmem:[#allocation7 + $0x18] sm:$0xff]   ;;  %s922_s7 = scalar_lea.vmem %s1237_s12, 512  ;;  %p1305_p0 = scmp.ne.s32.totalorder %s1300_s23, 0 }
  0x6d   : > { %728 = vmatpush3.bf16.msra.mxu1 %v828_v5  ;;  %v824_v11 = vld [vmem:[#allocation5 + $0x30] sm:$0xff]   ;;  %v832_v12 = vld [vmem:[#allocation7 + $0x20] sm:$0xff]   ;;  %v825_v13 = vld [vmem:[#allocation5 + $0x38] sm:$0xff]   ;;  %p923_p11 = scmp.ne.s32.totalorder %s1237_s12, %s922_s7  ;;  %s999_s6 = smov [#allocation8]  }
  0x6e   : > { %729 = vmatprep.subr.bf16.mxu1 %v829_v6  ;;  %v833_v14 = vld [vmem:[#allocation7 + $0x28] sm:$0xff]   ;;  %v834_v16 = vld [vmem:[#allocation7 + $0x30] sm:$0xff]   ;;  %v835_v17 = vld [vmem:[#allocation7 + $0x38] sm:$0xff]   ;;  %s926_s8 = sshll.u32 %s999_s6, 4  ;;  %s927_s8 = int_to_ptr.vmem [resolvable:$false] %s926_s8 }
  0x6f   : > { %710 = vmatpush3.bf16.msra.mxu0 %v819_v1  ;;  %v827_v15 = vld [vmem:[%s1217_s9 + $0x8] sm:$0xff]   ;;  %v660_v18 = vld [vmem:[%s1288_s2] ss:$0 sm:$0xff]  ;;  %p924_p2 = pnand %p923_p11, %p1305_p0  ;;  %s928_s9 = scalar_lea.vmem %s927_s8, 1024 }
  0x70   : > { %711 = vmatprep.subr.bf16.mxu0 %v820_v2  ;;  %v671_v33 = vld [vmem:[%s1290_s4] ss:$0 sm:$0xff]  ;;  %p929_p7 = scmp.lt.s32.totalorder %s1237_s12, %s927_s8  ;;  %p930_p9 = scmp.lt.s32.totalorder %s928_s9, %s922_s7 }
  0x71   : > { %730 = vmatpush3.bf16.msra.mxu1 %v829_v6  ;;  %p925_p3 = pneg %p924_p2 }
  0x72   : > { %731 = vmatprep.subr.bf16.mxu1 %v830_v8  ;;  %p931_p12 = por %p930_p9, %p929_p7 }
  0x73   : > { %712 = vmatpush3.bf16.msra.mxu0 %v820_v2 }
  0x74   : > { %713 = vmatprep.subr.bf16.mxu0 %v821_v3  ;;  %p932_p1 = pnand %p931_p12, %p925_p3 }
  0x75   : > { %732 = vmatpush3.bf16.msra.mxu1 %v830_v8 }
  0x76   : > { %733 = vmatprep.subr.bf16.mxu1 %v831_v10 }
  0x77   : > { %714 = vmatpush3.bf16.msra.mxu0 %v821_v3 }
  0x78   : > { %715 = vmatprep.subr.bf16.mxu0 %v822_v7 }
  0x79   : > { %734 = vmatpush3.bf16.msra.mxu1 %v831_v10 }
  0x7a   : > { %735 = vmatprep.subr.bf16.mxu1 %v832_v12 }
  0x7b   : > { %716 = vmatpush3.bf16.msra.mxu0 %v822_v7 }
  0x7c   : > { %717 = vmatprep.subr.bf16.mxu0 %v823_v9 }
  0x7d   : > { %736 = vmatpush3.bf16.msra.mxu1 %v832_v12 }
  0x7e   : > { %737 = vmatprep.subr.bf16.mxu1 %v833_v14 }
  0x7f   : > { %718 = vmatpush3.bf16.msra.mxu0 %v823_v9 }
  0x80   : > { %719 = vmatprep.subr.bf16.mxu0 %v824_v11 }
  0x81   : > { %738 = vmatpush3.bf16.msra.mxu1 %v833_v14 }
  0x82   : > { %739 = vmatprep.subr.bf16.mxu1 %v834_v16 }
  0x83   : > { %720 = vmatpush3.bf16.msra.mxu0 %v824_v11 }
  0x84   : > { %721 = vmatprep.subr.bf16.mxu0 %v825_v13 }
  0x85   : > { %740 = vmatpush3.bf16.msra.mxu1 %v834_v16 }
  0x86   : > { %741 = vmatprep.subr.bf16.mxu1 %v835_v17 }
  0x87   : > { %722 = vmatpush3.bf16.msra.mxu0 %v825_v13 }
  0x89   : > { %742 = vmatpush3.bf16.msra.mxu1 %v835_v17 }
  0x8a   : > { %724 = vmatmul.mubr.bf16.vlgmr.msra.gmra.mrb[0].mxu0 %v827_v15 }
 0x15d   : > { %v725_v19 = vpop.f32.mrb[0].mxu0 }
 0x15e   : > { %v405_v20 = vadd.f32 %v725_v19, %v660_v18  ;;  %v396_v21 = vpop.f32.mrb[1].mxu0 }
 0x15f   : > { %v397_v22 = vadd.f32 %v660_v18, %v396_v21  ;;  %v726_v23 = vpop.f32.mrb[2].mxu0 }
 0x160   : > { %v408_v24 = vadd.f32 %v726_v23, %v660_v18  ;;  %v399_v25 = vpop.f32.mrb[3].mxu0  ;;  %v413_v27 = vmax.f32 %v405_v20, 0.0 }
 0x161   : > { %v400_v26 = vadd.f32 %v660_v18, %v399_v25  ;;  %v411_v29 = vmax.f32 %v397_v22, 0.0 }
 0x162   : > { %v414_v28 = vmax.f32 %v408_v24, 0.0 }
 0x163   : > { %v412_v30 = vmax.f32 %v400_v26, 0.0 }
 0x164   : > { %v416_v31 = vpack.c.bf16 %v414_v28, %v413_v27 }
 0x165   : > { %v415_v32 = vpack.c.bf16 %v412_v30, %v411_v29 }
 0x167   : > { %743 = vmatprep.mubr.bf16.mxu1 %v415_v32 }
 0x168   : > { %744 = vmatmul.mubr.bf16.vlgmr.msra.gmra.mrb[0].mxu1 %v416_v31 }
 0x23b   : > { %v745_v34 = vpop.f32.mrb[0].mxu1 }
 0x23c   : > { %v531_v35 = vadd.f32 %v745_v34, %v671_v33  ;;  %v522_v36 = vpop.f32.mrb[1].mxu1 }
 0x23d   : > { %v523_v37 = vadd.f32 %v671_v33, %v522_v36  ;;  %v746_v38 = vpop.f32.mrb[2].mxu1 }
 0x23e   : > { %539 = vst [vmem:[%s271_s28 + $0x10] sm:$0xff] %v531_v35  ;;  %v534_v39 = vadd.f32 %v746_v38, %v671_v33  ;;  %v525_v40 = vpop.f32.mrb[3].mxu1 }
 0x23f   : > { %537 = vst [vmem:[%s271_s28] sm:$0xff] %v523_v37  ;;  %v526_v41 = vadd.f32 %v671_v33, %v525_v40 }
 0x240   : > { %540 = vst [vmem:[%s271_s28 + $0x18] sm:$0xff] %v534_v39 }
 0x241   : > { %538 = vst [vmem:[%s271_s28 + $0x8] sm:$0xff] %v526_v41 }
 0x242   : > { %935 = shalt.err (!%p932_p1)
}
 0x243   : > { %s936_s24 = scalar_lea.hbm %s1242_s17, 512  ;;  %s940_s16 = scalar_lea.hbm %s1291_s5, 1024 }
 0x244   : > { %p937_p13 = scmp.ne.s32.totalorder %s1242_s17, %s936_s24  ;;  %p941_p4 = scmp.lt.u32.totalorder %s1242_s17, %s1291_s5 }
 0x245   : > { %p942_p5 = scmp.lt.u32.totalorder %s940_s16, %s936_s24  ;;  %p944_p11 = scmp.lt.u32.totalorder %s936_s24, %s1242_s17 }
 0x246   : > { %p938_p6 = pnand %p937_p13, %p1305_p0 }
 0x247   : > { %p943_p8 = por %p942_p5, %p941_p4 }
 0x248   : > { %p939_p10 = pneg %p938_p6 }
 0x249   : > { %p945_p2 = por %p944_p11, %p943_p8 }
 0x24b   : > { %p946_p3 = pnand %p945_p2, %p939_p10 }
 0x24d   : > { %949 = shalt.err (!%p946_p3)
}
 0x24e   : > { %s1000_s13 = smov 128   ;;  %s1001_s30 = smov 8  }
 0x24f   : > { %757 = dma.vmem_to_hbm [thread:$0]  (%p1305_p0), %s1237_s12, 512, %s1242_s17, %s542_s22, %s1000_s13, %s1000_s13, %s1001_s30  }
 0x250 PF: > { %s570_s11 = sand.u32 1, %s980_s18   ;;  %p1306_p7 = scmp.ne.s32.totalorder %s1296_s25, 0 }
 0x251   : > { %p1307_p9 = scmp.ge.s32.totalorder %s992_s21, 2  ;;  %s571_s7 = scalar_lea.sflag [#allocation4], %s570_s11 }
 0x253   : > { %p771_p12 = pnand %p1307_p9, %p1306_p7 }
 0x255   : > { %975 = dma.done.wait (!%p771_p12), %s571_s7, 512  }
 0x256   : > { %977 = vsyncadd (!%p771_p12), %s571_s7, 4294966784  ;;  %p19_p1 = scmp.ge.s32.totalorder %s1148_s29, 4   ;;  %s1308_s18 = smov %s984_s19 }
 0x257   : > { %s1309_s19 = smov %s988_s20  ;;  %s1310_s20 = smov %s1164_s27 }
 0x258   : > { %s1311_s21 = smov %s1148_s29  ;;  %21 = sbr.rel (!%p19_p1) target bundleno = 6 (0x6), region = 93 }
 0x25f   :  { %576 = vsyncpa [#allocation3], 1 }
 0x260   :  { %578 = vsyncpa [#allocation3 + $0x1], 1 }
 0x261   :  { %579 = vsyncpa [#allocation6], 1 }
 0x262   :  { %580 = vsyncpa [#allocation4], 1 }
 0x263   :  { %582 = vsyncpa [#allocation4 + $0x1], 1 }

</bundles_post_ra>
